<compile_context>
chip_gen: v7x
topology: tpu7x:2x2x1
jax: 0.10.0
libtpu: 0.0.40
codegen_flags: <defaults>
</compile_context>

<pallas_src>
import jax
import jax.numpy as jnp
from jax.experimental import pallas as pl
from jax.experimental.pallas import tpu as pltpu


def _critic_mlp_kernel(obs_ref, act_ref, w1o_ref, w1a_ref, b1_ref,
                       w2_ref, b2_ref, w3_ref, b3_ref, out_ref):
    """One batch tile of the 3-layer critic MLP, entirely in VMEM."""
    obs = obs_ref[...]                                   # (TB, obs_dim) f32
    act = act_ref[...]                                   # (TB, act_dim) f32

    # Layer 1: fused concat — cat([obs, act]) @ W1 == obs @ W1o + act @ W1a.
    h1 = (jnp.dot(obs, w1o_ref[...], preferred_element_type=jnp.float32)
          + jnp.dot(act, w1a_ref[...], preferred_element_type=jnp.float32)
          + b1_ref[...])
    h1 = jnp.maximum(h1, 0.0)                            # (TB, Hp)

    # Layer 2: Linear(H, H) + ReLU on the MXU.
    h2 = jnp.dot(h1, w2_ref[...], preferred_element_type=jnp.float32) + b2_ref[...]
    h2 = jnp.maximum(h2, 0.0)                            # (TB, Hp)

    # Layer 3: Linear(H, 1) as VPU multiply + lane reduce (MXU stays free).
    # Output is written lane-dense: batch on the lane axis -> (1, TB) row.
    q = jnp.sum(h2 * w3_ref[...], axis=-1)               # (TB,)
    out_ref[...] = (q[None, :] + b3_ref[...]).astype(out_ref.dtype)


def critic_forward(obs, action, params, *, block_batch=4096):
    """Run the Pallas critic. Returns q of shape (B, 1) like the PyTorch module."""
    B, obs_dim = obs.shape
    act_dim = action.shape[1]

    if B <= block_batch:
        tb = B                 # single block: full-extent shapes are always legal
        bp = B
    else:
        # Tiled path: TB must be a multiple of 128 (lane-dense out) and of 8.
        assert block_batch % 128 == 0, "block_batch must be a multiple of 128"
        tb = block_batch
        bp = tb * pl.cdiv(B, tb)
        if bp != B:            # pad batch so the grid tiles evenly; sliced off below
            pad = bp - B
            obs = jnp.pad(obs, ((0, pad), (0, 0)))
            action = jnp.pad(action, ((0, pad), (0, 0)))

    w1o, w1a, b1 = params["w1_obs"], params["w1_act"], params["b1"]
    w2, b2, w3, b3 = params["w2"], params["b2"], params["w3"], params["b3"]

    # Weights/biases: constant block index -> loaded once, VMEM-resident.
    const = lambda shape: pl.BlockSpec(shape, lambda i: (0, 0))

    out = pl.pallas_call(
        _critic_mlp_kernel,
        out_shape=jax.ShapeDtypeStruct((1, bp), jnp.float32),
        grid=(bp // tb,),
        in_specs=[
            pl.BlockSpec((tb, obs_dim), lambda i: (i, 0)),   # batch-tiled obs
            pl.BlockSpec((tb, act_dim), lambda i: (i, 0)),   # batch-tiled action
            const(w1o.shape), const(w1a.shape), const(b1.shape),
            const(w2.shape), const(b2.shape),
            const(w3.shape), const(b3.shape),
        ],
        out_specs=pl.BlockSpec((1, tb), lambda i: (0, i)),   # lane-dense q row
        compiler_params=pltpu.CompilerParams(
            dimension_semantics=("parallel",)),              # megacore over batch
    )(obs, action, w1o, w1a, b1, w2, b2, w3, b3)

    # Back to PyTorch layout (B, 1); drop any batch padding.
    return out[0, :B].reshape(B, 1)


def _orthogonal(key, out_features, in_features, gain=1.0):
    """Deterministic orthogonal init matching nn.init.orthogonal_ semantics
    (weight shape (out, in)); returned transposed to (in, out) for x @ W."""
    rows, cols = out_features, in_features
    flat = jax.random.normal(key, (max(rows, cols), min(rows, cols)), jnp.float32)
    q, r = jnp.linalg.qr(flat)
    q = q * jnp.sign(jnp.diagonal(r))        # make decomposition unique
    if rows < cols:
        q = q.T
    w_torch_layout = gain * q[:rows, :cols]  # (out, in)
    return w_torch_layout.T                  # (in, out) for the kernel


def init_critic_params(key, obs_dim, action_dim, hidden_size, *, lane_pad=128):
    """Build kernel params: W1 split into obs/act halves, hidden dims zero-padded
    to a multiple of `lane_pad` (padding is mathematically inert through ReLU)."""
    n_features = obs_dim + action_dim
    hp = ((hidden_size + lane_pad - 1) // lane_pad) * lane_pad
    pad = hp - hidden_size
    k1, k2, k3 = jax.random.split(key, 3)
    bias_val = 1e-06

    w1 = _orthogonal(k1, hidden_size, n_features)   # (n_features, H)
    w2 = _orthogonal(k2, hidden_size, hidden_size)  # (H, H)
    w3 = _orthogonal(k3, 1, hidden_size)            # (H, 1)

    w1p = jnp.pad(w1, ((0, 0), (0, pad)))           # (n_features, Hp)
    w2p = jnp.pad(w2, ((0, pad), (0, pad)))         # (Hp, Hp)
    w3p = jnp.pad(w3, ((0, pad), (0, 0)))           # (Hp, 1)

    return {
        "w1_obs": w1p[:obs_dim],                    # (obs_dim, Hp)
        "w1_act": w1p[obs_dim:],                    # (action_dim, Hp)
        "b1": jnp.pad(jnp.full((1, hidden_size), bias_val, jnp.float32),
                      ((0, 0), (0, pad))),          # (1, Hp)
        "w2": w2p,                                  # (Hp, Hp)
        "b2": jnp.pad(jnp.full((1, hidden_size), bias_val, jnp.float32),
                      ((0, 0), (0, pad))),          # (1, Hp)
        "w3": w3p.T,                                # (1, Hp) row for the VPU reduce
        "b3": jnp.full((1, 1), bias_val, jnp.float32),
    }


if __name__ == "__main__":
    key = jax.random.PRNGKey(0)
    k_obs, k_act, k_params = jax.random.split(key, 3)

    batch = 256
    obs_dim = 12
    action_dim = 4
    hidden_size = 32

    obs = jax.random.normal(k_obs, (batch, obs_dim), jnp.float32)
    action = jax.random.normal(k_act, (batch, action_dim), jnp.float32)
    params = init_critic_params(k_params, obs_dim, action_dim, hidden_size)

    # block_batch=128 so even this small example exercises a multi-block grid.
    q = critic_forward(obs, action, params, block_batch=128)
    jax.block_until_ready(q)

    # Reference check: the original PyTorch formulation (concat -> 3 Linears),
    # using the unpadded logical weights recovered from the padded params.
    H = hidden_size
    w1 = jnp.concatenate([params["w1_obs"][:, :H], params["w1_act"][:, :H]], axis=0)
    w2 = params["w2"][:H, :H]
    w3 = params["w3"][:, :H].T                      # (H, 1)
    b1 = params["b1"][:, :H]
    b2 = params["b2"][:, :H]
    b3 = params["b3"]

    pair = jnp.concatenate([obs, action], axis=1)
    h1 = jnp.maximum(pair @ w1 + b1, 0.0)
    h2 = jnp.maximum(h1 @ w2 + b2, 0.0)
    q_ref = h2 @ w3 + b3

    assert q.shape == (batch, 1)
    assert jnp.allclose(q, q_ref, atol=1e-5, rtol=1e-5)

    print("KERNEL_OK")
</pallas_src>

<mosaic_0001>
module attributes {stable_mosaic.version = 11 : i64} {
  func.func @_critic_mlp_kernel(%arg0: i32, %arg1: memref<128x12xf32, #tpu.memory_space<vmem>>, %arg2: memref<128x4xf32, #tpu.memory_space<vmem>>, %arg3: memref<12x128xf32, #tpu.memory_space<vmem>>, %arg4: memref<4x128xf32, #tpu.memory_space<vmem>>, %arg5: memref<1x128xf32, #tpu.memory_space<vmem>>, %arg6: memref<128x128xf32, #tpu.memory_space<vmem>>, %arg7: memref<1x128xf32, #tpu.memory_space<vmem>>, %arg8: memref<1x128xf32, #tpu.memory_space<vmem>>, %arg9: memref<1x1xf32, #tpu.memory_space<vmem>>, %arg10: memref<1x128xf32, #tpu.memory_space<vmem>>) attributes {dimension_semantics = [#tpu.dimension_semantics<parallel>], iteration_bounds = array<i64: 2>, scalar_prefetch = 0 : i64, scratch_operands = 0 : i64, tpu.core_type = #tpu.core_type<tc>, window_params = [{transform_indices = @transform_0, window_bounds = array<i64: 128, 12>}, {transform_indices = @transform_1, window_bounds = array<i64: 128, 4>}, {pipeline_mode = #tpu.pipeline_mode<synchronous>, transform_indices = @transform_2, window_bounds = array<i64: 12, 128>}, {pipeline_mode = #tpu.pipeline_mode<synchronous>, transform_indices = @transform_3, window_bounds = array<i64: 4, 128>}, {pipeline_mode = #tpu.pipeline_mode<synchronous>, transform_indices = @transform_4, window_bounds = array<i64: 1, 128>}, {pipeline_mode = #tpu.pipeline_mode<synchronous>, transform_indices = @transform_5, window_bounds = array<i64: 128, 128>}, {pipeline_mode = #tpu.pipeline_mode<synchronous>, transform_indices = @transform_6, window_bounds = array<i64: 1, 128>}, {pipeline_mode = #tpu.pipeline_mode<synchronous>, transform_indices = @transform_7, window_bounds = array<i64: 1, 128>}, {pipeline_mode = #tpu.pipeline_mode<synchronous>, transform_indices = @transform_8, window_bounds = array<i64: 1, 1>}, {transform_indices = @transform_9, window_bounds = array<i64: 1, 128>}]} {
    %c0 = arith.constant 0 : index
    %c0_0 = arith.constant 0 : index
    %0 = vector.load %arg1[%c0, %c0_0] : memref<128x12xf32, #tpu.memory_space<vmem>>, vector<128x12xf32>
    %c0_1 = arith.constant 0 : index
    %c0_2 = arith.constant 0 : index
    %1 = vector.load %arg2[%c0_1, %c0_2] : memref<128x4xf32, #tpu.memory_space<vmem>>, vector<128x4xf32>
    %c0_3 = arith.constant 0 : index
    %c0_4 = arith.constant 0 : index
    %2 = vector.load %arg3[%c0_3, %c0_4] : memref<12x128xf32, #tpu.memory_space<vmem>>, vector<12x128xf32>
    %cst = arith.constant dense<0.000000e+00> : vector<128x128xf32>
    %3 = tpu.matmul %0, %2, %cst {dimension_numbers = #tpu.dot_dimension_numbers<[1], [0], [0], [1], [0, 0, 1, 1], [], []>} : vector<128x12xf32>, vector<12x128xf32>, vector<128x128xf32> -> vector<128x128xf32>
    %c0_5 = arith.constant 0 : index
    %c0_6 = arith.constant 0 : index
    %4 = vector.load %arg4[%c0_5, %c0_6] : memref<4x128xf32, #tpu.memory_space<vmem>>, vector<4x128xf32>
    %cst_7 = arith.constant dense<0.000000e+00> : vector<128x128xf32>
    %5 = tpu.matmul %1, %4, %cst_7 {dimension_numbers = #tpu.dot_dimension_numbers<[1], [0], [0], [1], [0, 0, 1, 1], [], []>} : vector<128x4xf32>, vector<4x128xf32>, vector<128x128xf32> -> vector<128x128xf32>
    %6 = arith.addf %3, %5 : vector<128x128xf32>
    %c0_8 = arith.constant 0 : index
    %c0_9 = arith.constant 0 : index
    %7 = vector.load %arg5[%c0_8, %c0_9] : memref<1x128xf32, #tpu.memory_space<vmem>>, vector<1x128xf32>
    %8 = vector.broadcast %7 : vector<1x128xf32> to vector<128x128xf32>
    %9 = arith.addf %6, %8 : vector<128x128xf32>
    %cst_10 = arith.constant 0.000000e+00 : f32
    %10 = vector.broadcast %cst_10 : f32 to vector<128x128xf32>
    %11 = arith.maximumf %9, %10 : vector<128x128xf32>
    %c0_11 = arith.constant 0 : index
    %c0_12 = arith.constant 0 : index
    %12 = vector.load %arg6[%c0_11, %c0_12] : memref<128x128xf32, #tpu.memory_space<vmem>>, vector<128x128xf32>
    %cst_13 = arith.constant dense<0.000000e+00> : vector<128x128xf32>
    %13 = tpu.matmul %11, %12, %cst_13 {dimension_numbers = #tpu.dot_dimension_numbers<[1], [0], [0], [1], [0, 0, 1, 1], [], []>} : vector<128x128xf32>, vector<128x128xf32>, vector<128x128xf32> -> vector<128x128xf32>
    %c0_14 = arith.constant 0 : index
    %c0_15 = arith.constant 0 : index
    %14 = vector.load %arg7[%c0_14, %c0_15] : memref<1x128xf32, #tpu.memory_space<vmem>>, vector<1x128xf32>
    %15 = vector.broadcast %14 : vector<1x128xf32> to vector<128x128xf32>
    %16 = arith.addf %13, %15 : vector<128x128xf32>
    %cst_16 = arith.constant 0.000000e+00 : f32
    %17 = vector.broadcast %cst_16 : f32 to vector<128x128xf32>
    %18 = arith.maximumf %16, %17 : vector<128x128xf32>
    %c0_17 = arith.constant 0 : index
    %c0_18 = arith.constant 0 : index
    %19 = vector.load %arg8[%c0_17, %c0_18] : memref<1x128xf32, #tpu.memory_space<vmem>>, vector<1x128xf32>
    %20 = vector.broadcast %19 : vector<1x128xf32> to vector<128x128xf32>
    %21 = arith.mulf %18, %20 : vector<128x128xf32>
    %cst_19 = arith.constant dense<0.000000e+00> : vector<128xf32>
    %22 = vector.multi_reduction <add>, %21, %cst_19 [1] : vector<128x128xf32> to vector<128xf32>
    %23 = vector.shape_cast %22 : vector<128xf32> to vector<1x128xf32>
    %c0_20 = arith.constant 0 : index
    %c0_21 = arith.constant 0 : index
    %24 = vector.load %arg9[%c0_20, %c0_21] : memref<1x1xf32, #tpu.memory_space<vmem>>, vector<1x1xf32>
    %25 = vector.broadcast %24 : vector<1x1xf32> to vector<1x128xf32>
    %26 = arith.addf %23, %25 : vector<1x128xf32>
    %c0_22 = arith.constant 0 : index
    %c0_23 = arith.constant 0 : index
    %27 = vector.load %arg10[%c0_22, %c0_23] : memref<1x128xf32, #tpu.memory_space<vmem>>, vector<1x128xf32>
    tpu.vector_store %arg10[%c0_22, %c0_23], %26 {strides = array<i32>} : memref<1x128xf32, #tpu.memory_space<vmem>>, vector<1x128xf32>,
    return
  }
  func.func @transform_0(%arg0: i32) -> (i32, i32) {
    %c0_i32 = arith.constant 0 : i32
    %c0_i32_0 = arith.constant 0 : i32
    return %arg0, %c0_i32 : i32, i32
  }
  func.func @transform_1(%arg0: i32) -> (i32, i32) {
    %c0_i32 = arith.constant 0 : i32
    %c0_i32_0 = arith.constant 0 : i32
    return %arg0, %c0_i32 : i32, i32
  }
  func.func @transform_2(%arg0: i32) -> (i32, i32) {
    %c0_i32 = arith.constant 0 : i32
    %c0_i32_0 = arith.constant 0 : i32
    %c0_i32_1 = arith.constant 0 : i32
    return %c0_i32, %c0_i32_0 : i32, i32
  }
  func.func @transform_3(%arg0: i32) -> (i32, i32) {
    %c0_i32 = arith.constant 0 : i32
    %c0_i32_0 = arith.constant 0 : i32
    %c0_i32_1 = arith.constant 0 : i32
    return %c0_i32, %c0_i32_0 : i32, i32
  }
  func.func @transform_4(%arg0: i32) -> (i32, i32) {
    %c0_i32 = arith.constant 0 : i32
    %c0_i32_0 = arith.constant 0 : i32
    %c0_i32_1 = arith.constant 0 : i32
    return %c0_i32, %c0_i32_0 : i32, i32
  }
  func.func @transform_5(%arg0: i32) -> (i32, i32) {
    %c0_i32 = arith.constant 0 : i32
    %c0_i32_0 = arith.constant 0 : i32
    %c0_i32_1 = arith.constant 0 : i32
    return %c0_i32, %c0_i32_0 : i32, i32
  }
  func.func @transform_6(%arg0: i32) -> (i32, i32) {
    %c0_i32 = arith.constant 0 : i32
    %c0_i32_0 = arith.constant 0 : i32
    %c0_i32_1 = arith.constant 0 : i32
    return %c0_i32, %c0_i32_0 : i32, i32
  }
  func.func @transform_7(%arg0: i32) -> (i32, i32) {
    %c0_i32 = arith.constant 0 : i32
    %c0_i32_0 = arith.constant 0 : i32
    %c0_i32_1 = arith.constant 0 : i32
    return %c0_i32, %c0_i32_0 : i32, i32
  }
  func.func @transform_8(%arg0: i32) -> (i32, i32) {
    %c0_i32 = arith.constant 0 : i32
    %c0_i32_0 = arith.constant 0 : i32
    %c0_i32_1 = arith.constant 0 : i32
    return %c0_i32, %c0_i32_0 : i32, i32
  }
  func.func @transform_9(%arg0: i32) -> (i32, i32) {
    %c0_i32 = arith.constant 0 : i32
    %c0_i32_0 = arith.constant 0 : i32
    return %c0_i32, %arg0 : i32, i32
  }
}

</mosaic_0001>

<bundles_post_ra>
// kernel: tpu_custom_call.1
= control target key start
LH: loop header
LB: loop body
LE: loop exit
PB: predicated region body
PF: predicated region fallthrough
CT: control target
= control target key end

     0   :  { %s2089_s0 = inlined_call_operand.vmem [shape: f32[256,12], index: 0, kind: input, shape index: {}]   ;;  %s2090_s1 = inlined_call_operand.vmem [shape: f32[256,4], index: 1, kind: input, shape index: {}]   ;;  %s2091_s2 = inlined_call_operand.vmem [shape: f32[12,128], index: 2, kind: input, shape index: {}]   ;;  %s2092_s3 = inlined_call_operand.vmem [shape: f32[4,128], index: 3, kind: input, shape index: {}]   ;;  %s2093_s4 = inlined_call_operand.vmem [shape: f32[1,128], index: 4, kind: input, shape index: {}]   ;;  %s2094_s5 = inlined_call_operand.vmem [shape: f32[128,128], index: 5, kind: input, shape index: {}]   ;;  %s2095_s6 = inlined_call_operand.vmem [shape: f32[1,128], index: 6, kind: input, shape index: {}]   ;;  %s2096_s7 = inlined_call_operand.vmem [shape: f32[1,128], index: 7, kind: input, shape index: {}]   ;;  %s2097_s8 = inlined_call_operand.<no memory space> [shape: f32[1,1], index: 8, kind: input, shape index: {}]   ;;  %s2098_s9 = inlined_call_operand.hbm [shape: f32[1,256], index: 9, kind: output, shape index: {}]  }
   0x1   :  { %v14_v0 = vstv %s2097_s8 }
   0x2   :  { %15 = vst [vmem:[#allocation2] sm:$0x1] %v14_v0 }
   0x3   :  { %16 = vsyncpa [#allocation4], 0 }
   0x4   :  { %18 = vsyncpa [#allocation4 + $0x1], 0  ;;  %s1741_s11 = smov 0   ;;  %s1743_s12 = smov 0  }
   0x5   :  { %s1745_s13 = smov 0   ;;  %s1747_s14 = smov 0  }
   0x6 LB: > { %s1298_s8 = sadd.s32 4294967295, %s1683_s14   ;;  %s1299_s15 = sadd.s32 4294967294, %s1683_s14   ;;  %s1683_s14 = sphi %s1747_s14, %s2106_s14   ;;  %s1679_s13 = sphi %s1745_s13, %s2105_s13   ;;  %s1675_s12 = sphi %s1743_s12, %s2104_s12   ;;  %s1671_s11 = sphi %s1741_s11, %s2103_s11  }
   0x7   : > { %s1764_s16 = sadd.s32 1, %s1683_s14   ;;  %s230_s17 = sadd.s32 1, %s1679_s13 }
   0x8   : > { %s227_s18 = ssub.s32 %s1683_s14, %s1764_s16  ;;  %p240_p0 = scmp.ne.s32.totalorder %s1679_s13, %s1675_s12 }
   0x9   : > { %p228_p1 = scmp.eq.s32.totalorder %s227_s18, 0  ;;  %p241_p2 = scmp.eq.s32.totalorder %s1298_s8, 1 }
   0xa   : > { %p246_p3 = scmp.ne.s32.totalorder %s1675_s12, %s1671_s11  ;;  %p247_p4 = scmp.eq.s32.totalorder %s1299_s15, 1 }
   0xb   : > { %s1774_s19 = scalar_select %p228_p1, %s1679_s13, %s230_s17  }
   0xc   : > { %p1776_p5 = por %p241_p2, %p240_p0  ;;  %p1780_p6 = por %p247_p4, %p246_p3 }
   0xd   : > { %p1302_p7 = scmp.ge.s32.totalorder %s1683_s14, 1  ;;  %p304_p8 = scmp.lt.s32.totalorder %s1683_s14, 3 }
   0xf   : > { %p305_p9 = pnand %p1302_p7, %p304_p8 }
  0x10   : > { %v390_v1 = vld [vmem:[%s2092_s3] sm:$0xf] (!%p305_p9)  ;;  %vm440_vm0 = vcmask (!%p305_p9), 1043456   ;;  %s1789_s24 = sshll.u32 (!%p305_p9), %s1298_s8, 4  ;;  %v389_v3 = vld [vmem:[%s2091_s2 + $0x8] sm:$0xf] (!%p305_p9) }
  0x11   : > { %308 = sbr.rel (%p305_p9) target bundleno = 728 (0x2d8), region = 56  ;;  %v388_v2 = vld [vmem:[%s2091_s2] sm:$0xff] (!%p305_p9)  ;;  %1414 = vmatprep.subr.msk.mxu0 (!%p305_p9), %vm440_vm0, %v390_v1  ;;  %p345_p10 = scmp.lt.s32.totalorder (!%p305_p9), %s1789_s24, 31  ;;  %vm1685_vm1 = vmmov (!%p305_p9), 1   ;;  %v826_v7 = vld [vmem:[%s2094_s5 + $0x8] sm:$0xff] (!%p305_p9)  ;;  %v827_v8 = vld [vmem:[%s2094_s5 + $0x10] sm:$0xff] (!%p305_p9) }
  0x12   : > { %v825_v4 = vld [vmem:[%s2094_s5] sm:$0xff] (!%p305_p9)  ;;  %1415 = vmatpush3.msk.msra.mxu0 (!%p305_p9), %vm440_vm0, %v390_v1  ;;  %v1524_v5 = vpack.c.bf16 (!%p305_p9), %v389_v3, %v388_v2  ;;  %vm1801_vm2 = vmpackc.low (!%p305_p9), %vm440_vm0, %vm1685_vm1  ;;  %v828_v10 = vld [vmem:[%s2094_s5 + $0x18] sm:$0xff] (!%p305_p9)  ;;  %vm391_vm3 = vcmask (!%p305_p9), 31744   ;;  %vm589_vm4 = vcmask (!%p305_p9), 97280   ;;  %vm1117_vm5 = vcmask (!%p305_p9), 130112   ;;  %s342_s28 = sand.u32 (!%p305_p9), 1, %s1675_s12  }
  0x13   : > { %v1530_v9 = vpack.c.bf16 (!%p305_p9), %v826_v7, %v825_v4  ;;  %v1534_v11 = vpack.c.bf16 (!%p305_p9), %v828_v10, %v827_v8  ;;  %v829_v12 = vld [vmem:[%s2094_s5 + $0x20] sm:$0xff] (!%p305_p9)  ;;  %v830_v13 = vld [vmem:[%s2094_s5 + $0x28] sm:$0xff] (!%p305_p9)  ;;  %v831_v18 = vld [vmem:[%s2094_s5 + $0x30] sm:$0xff] (!%p305_p9)  ;;  %vm1124_vm6 = vcmask (!%p305_p9), 195712   ;;  %vm1131_vm7 = vcmask (!%p305_p9), 261312   ;;  %s343_s29 = scalar_lea.vmem (!%p305_p9), [#allocation3], %s342_s28 }
  0x14   : > { %1526 = vmatprep.subr.msk.bf16.mxu0 (!%p305_p9), %vm1801_vm2, %v1524_v5  ;;  %v1538_v17 = vpack.c.bf16 (!%p305_p9), %v830_v13, %v829_v12  ;;  %v832_v19 = vld [vmem:[%s2094_s5 + $0x38] sm:$0xff] (!%p305_p9)  ;;  %v833_v23 = vld [vmem:[%s2094_s5 + $0x40] sm:$0xff] (!%p305_p9)  ;;  %v834_v24 = vld [vmem:[%s2094_s5 + $0x48] sm:$0xff] (!%p305_p9)  ;;  %vm1138_vm8 = vcmask (!%p305_p9), 326912   ;;  %vm1145_vm9 = vcmask (!%p305_p9), 392512   ;;  %vm1152_vm10 = vcmask (!%p305_p9), 458112  }
  0x15   : > { %1531 = vmatprep.subr.bf16.mxu1 (!%p305_p9), %v1530_v9  ;;  %v1542_v22 = vpack.c.bf16 (!%p305_p9), %v832_v19, %v831_v18  ;;  %v1546_v27 = vpack.c.bf16 (!%p305_p9), %v834_v24, %v833_v23  ;;  %v835_v28 = vld [vmem:[%s2094_s5 + $0x50] sm:$0xff] (!%p305_p9)  ;;  %v836_v29 = vld [vmem:[%s2094_s5 + $0x58] sm:$0xff] (!%p305_p9)  ;;  %v837_v33 = vld [vmem:[%s2094_s5 + $0x60] sm:$0xff] (!%p305_p9)  ;;  %vm1159_vm11 = vcmask (!%p305_p9), 523712   ;;  %vm1166_vm12 = vcmask (!%p305_p9), 589312   ;;  %s1220_s10 = scalar_lea.sflag (!%p305_p9), [#allocation4], %s342_s28 }
  0x16   : > { %1533 = vmatpush3.bf16.msra.mxu1 (!%p305_p9), %v1530_v9  ;;  %v1550_v32 = vpack.c.bf16 (!%p305_p9), %v836_v29, %v835_v28  ;;  %v838_v34 = vld [vmem:[%s2094_s5 + $0x68] sm:$0xff] (!%p305_p9)  ;;  %v839_v59 = vld [vmem:[%s2094_s5 + $0x70] sm:$0xff] (!%p305_p9)  ;;  %v840_v60 = vld [vmem:[%s2094_s5 + $0x78] sm:$0xff] (!%p305_p9)  ;;  %vm1173_vm13 = vcmask (!%p305_p9), 654912   ;;  %vm1180_vm14 = vcmask (!%p305_p9), 720512   ;;  %vm1187_vm15 = vcmask (!%p305_p9), 786112  }
  0x17   : > { %1535 = vmatprep.subr.bf16.mxu1 (!%p305_p9), %v1534_v11  ;;  %v1554_v37 = vpack.c.bf16 (!%p305_p9), %v838_v34, %v837_v33  ;;  %v1558_v61 = vpack.c.bf16 (!%p305_p9), %v840_v60, %v839_v59  ;;  %v1341_v62 = vld [vmem:[%s2093_s4] ss:$0 sm:$0xff] (!%p305_p9)  ;;  %vm1194_vm0 = vcmask (!%p305_p9), 851712   ;;  %vm1201_vm1 = vcmask (!%p305_p9), 917312   ;;  %s1687_s17 = smov (!%p305_p9), [#allocation3]  }
  0x18   : > { %s1812_s18 = scalar_select %p345_p10, %s1789_s24, 31 }
  0x19   : > { %s1625_s22 = sshll.u32 %s1687_s17, 4  ;;  %s1626_s22 = int_to_ptr.vmem [resolvable:$false] %s1625_s22 }
  0x1a   : > { %s1304_s25 = sshll.u32 %s1812_s18, 3  ;;  %1537 = vmatpush3.bf16.msra.mxu1 %v1534_v11  ;;  %s1627_s23 = scalar_lea.vmem %s1626_s22, 32 }
  0x1b   : > { %s1831_s8 = scalar_lea.vmem %s2090_s1, %s1304_s25  ;;  %1539 = vmatprep.subr.bf16.mxu1 %v1538_v17  ;;  %s1892_s30 = scalar_lea.vmem %s2089_s0, %s1304_s25 }
  0x1c   : > { %v372_v14 = vld [vmem:[%s1831_s8] sm:$0xff]  ;;  %v373_v15 = vld [vmem:[%s1831_s8 + $0x8] sm:$0xff]  ;;  %v374_v16 = vld [vmem:[%s1831_s8 + $0x10] sm:$0xff] }
  0x1d   : > { %1416 = vmatprep.mubr.msk.f32.mxu0 %vm391_vm3, %v372_v14  ;;  %v375_v20 = vld [vmem:[%s1831_s8 + $0x18] sm:$0xff]  ;;  %v376_v21 = vld [vmem:[%s1831_s8 + $0x20] sm:$0xff]  ;;  %v377_v25 = vld [vmem:[%s1831_s8 + $0x28] sm:$0xff] }
  0x1e   : > { %1417 = vmatmul.mubr.msk.f32.vlgmr.msra.gmra.mrb[0].mxu0 %vm391_vm3, %v373_v15  ;;  %v378_v26 = vld [vmem:[%s1831_s8 + $0x30] sm:$0xff]  ;;  %1541 = vmatpush3.bf16.msra.mxu1 %v1538_v17  ;;  %v379_v30 = vld [vmem:[%s1831_s8 + $0x38] sm:$0xff]  ;;  %v380_v31 = vld [vmem:[%s1831_s8 + $0x40] sm:$0xff] }
  0x1f   : > { %1529 = vmatpush3.bf16.msk.msra.mxu0 %vm1801_vm2, %v1524_v5  ;;  %1419 = vmatprep.mubr.msk.f32.mxu0 %vm391_vm3, %v374_v16  ;;  %v381_v35 = vld [vmem:[%s1831_s8 + $0x48] sm:$0xff]  ;;  %v382_v36 = vld [vmem:[%s1831_s8 + $0x50] sm:$0xff]  ;;  %v383_v38 = vld [vmem:[%s1831_s8 + $0x58] sm:$0xff]  ;;  %vm1208_vm2 = vcmask 982912  }
  0x20   : > { %1543 = vmatprep.subr.bf16.mxu1 %v1542_v22  ;;  %v384_v39 = vld [vmem:[%s1831_s8 + $0x60] sm:$0xff]  ;;  %v385_v40 = vld [vmem:[%s1831_s8 + $0x68] sm:$0xff]  ;;  %v386_v41 = vld [vmem:[%s1831_s8 + $0x70] sm:$0xff] }
  0x21   : > { %v387_v42 = vld [vmem:[%s1831_s8 + $0x78] sm:$0xff]  ;;  %v356_v43 = vld [vmem:[%s1892_s30] sm:$0xff]  ;;  %v357_v44 = vld [vmem:[%s1892_s30 + $0x8] sm:$0xff]  ;;  %s2045_s8 = scalar_lea.hbm %s2098_s9, %s1789_s24 }
  0x22   : > { %1420 = vmatmul.mubr.msk.f32.gmra.mrb[2].mxu0 %vm391_vm3, %v375_v20  ;;  %1545 = vmatpush3.bf16.msra.mxu1 %v1542_v22  ;;  %v358_v45 = vld [vmem:[%s1892_s30 + $0x10] sm:$0xff]  ;;  %v359_v46 = vld [vmem:[%s1892_s30 + $0x18] sm:$0xff]  ;;  %v360_v47 = vld [vmem:[%s1892_s30 + $0x20] sm:$0xff] }
  0x23   : > { %1422 = vmatprep.mubr.msk.f32.mxu0 %vm391_vm3, %v376_v21  ;;  %1547 = vmatprep.subr.bf16.mxu1 %v1546_v27  ;;  %v361_v48 = vld [vmem:[%s1892_s30 + $0x28] sm:$0xff]  ;;  %v362_v49 = vld [vmem:[%s1892_s30 + $0x30] sm:$0xff]  ;;  %v363_v50 = vld [vmem:[%s1892_s30 + $0x38] sm:$0xff] }
  0x24   : > { %v364_v51 = vld [vmem:[%s1892_s30 + $0x40] sm:$0xff]  ;;  %v365_v52 = vld [vmem:[%s1892_s30 + $0x48] sm:$0xff]  ;;  %v366_v53 = vld [vmem:[%s1892_s30 + $0x50] sm:$0xff] }
  0x25   : > { %v367_v54 = vld [vmem:[%s1892_s30 + $0x58] sm:$0xff]  ;;  %v368_v55 = vld [vmem:[%s1892_s30 + $0x60] sm:$0xff]  ;;  %v369_v56 = vld [vmem:[%s1892_s30 + $0x68] sm:$0xff] }
  0x26   : > { %1423 = vmatmul.mubr.msk.f32.gmra.mrb[4].mxu0 %vm391_vm3, %v377_v25  ;;  %1549 = vmatpush3.bf16.msra.mxu1 %v1546_v27  ;;  %v370_v57 = vld [vmem:[%s1892_s30 + $0x70] sm:$0xff]  ;;  %v371_v58 = vld [vmem:[%s1892_s30 + $0x78] sm:$0xff]  ;;  %s1232_s30 = sshll.u32 %s343_s29, 4  ;;  %s2047_s30 = int_to_ptr.vmem [resolvable:$true] %s1232_s30 }
  0x27   : > { %1425 = vmatprep.mubr.msk.f32.mxu0 %vm391_vm3, %v378_v26  ;;  %1551 = vmatprep.subr.bf16.mxu1 %v1550_v32  ;;  %s1621_s15 = scalar_lea.vmem %s2047_s30, 16  ;;  %p1628_p0 = scmp.lt.s32.totalorder %s2047_s30, %s1626_s22 }
  0x28   : > { %p1622_p11 = scmp.ne.s32.totalorder %s2047_s30, %s1621_s15  ;;  %p1629_p1 = scmp.lt.s32.totalorder %s1627_s23, %s1621_s15 }
  0x2a   : > { %1426 = vmatmul.mubr.msk.f32.gmra.mrb[6].mxu0 %vm391_vm3, %v379_v30  ;;  %1553 = vmatpush3.bf16.msra.mxu1 %v1550_v32  ;;  %p1623_p12 = pnand %p1622_p11, %p1776_p5  ;;  %p1630_p2 = por %p1629_p1, %p1628_p0 }
  0x2b   : > { %1428 = vmatprep.mubr.msk.f32.mxu0 %vm391_vm3, %v380_v31  ;;  %1555 = vmatprep.subr.bf16.mxu1 %v1554_v37 }
  0x2c   : > { %p1624_p13 = pneg %p1623_p12 }
  0x2e   : > { %1429 = vmatmul.mubr.msk.f32.gmra.mrb[8].mxu0 %vm391_vm3, %v381_v35  ;;  %1557 = vmatpush3.bf16.msra.mxu1 %v1554_v37  ;;  %p1631_p3 = pnand %p1630_p2, %p1624_p13 }
  0x2f   : > { %1431 = vmatprep.mubr.msk.f32.mxu0 %vm391_vm3, %v382_v36  ;;  %1559 = vmatprep.subr.bf16.mxu1 %v1558_v61 }
  0x32   : > { %1432 = vmatmul.mubr.msk.f32.gmra.mrb[10].mxu0 %vm391_vm3, %v383_v38  ;;  %1561 = vmatpush3.bf16.msra.mxu1 %v1558_v61 }
  0x33   : > { %1434 = vmatprep.mubr.msk.f32.mxu0 %vm391_vm3, %v384_v39 }
  0x36   : > { %1435 = vmatmul.mubr.msk.f32.gmra.mrb[12].mxu0 %vm391_vm3, %v385_v40 }
  0x37   : > { %1437 = vmatprep.mubr.msk.f32.mxu0 %vm391_vm3, %v386_v41 }
  0x3a   : > { %1438 = vmatmul.mubr.msk.f32.gmra.mrb[14].mxu0 %vm391_vm3, %v387_v42  ;;  %vm1215_vm3 = vcmask 1048512  }
  0x3b   : > { %1444 = vmatprep.mubr.msk.f32.mxu0 %vm589_vm4, %v356_v43 }
  0x3e   : > { %1445 = vmatmul.mubr.msk.f32.vlgmr.msra.gmra.mrb[0].mxu0 %vm589_vm4, %v357_v44 }
  0x3f   : > { %1447 = vmatprep.mubr.msk.f32.mxu0 %vm589_vm4, %v358_v45 }
  0x42   : > { %1448 = vmatmul.mubr.msk.f32.gmra.mrb[2].mxu0 %vm589_vm4, %v359_v46 }
  0x43   : > { %1450 = vmatprep.mubr.msk.f32.mxu0 %vm589_vm4, %v360_v47  ;;  %v1686_v47 = vmov 0  }
  0x44   : > { %1619 = vset.pattern.permute.xlu1 %v1686_v47  ;;  %1620 = vset.pattern.permute.xlu0 %v1686_v47 }
  0x46   : > { %1451 = vmatmul.mubr.msk.f32.gmra.mrb[4].mxu0 %vm589_vm4, %v361_v48  ;;  %v1942_v48 = vld [vmem:[%s2095_s6] ss:$0 sm:$0xff] }
  0x47   : > { %1453 = vmatprep.mubr.msk.f32.mxu0 %vm589_vm4, %v362_v49 }
  0x4a   : > { %1454 = vmatmul.mubr.msk.f32.gmra.mrb[6].mxu0 %vm589_vm4, %v363_v50 }
  0x4b   : > { %1456 = vmatprep.mubr.msk.f32.mxu0 %vm589_vm4, %v364_v51 }
  0x4e   : > { %1457 = vmatmul.mubr.msk.f32.gmra.mrb[8].mxu0 %vm589_vm4, %v365_v52 }
  0x4f   : > { %1459 = vmatprep.mubr.msk.f32.mxu0 %vm589_vm4, %v366_v53  ;;  %v1949_v53 = vld [vmem:[%s2096_s7] ss:$0 sm:$0xff] }
  0x52   : > { %1460 = vmatmul.mubr.msk.f32.gmra.mrb[10].mxu0 %vm589_vm4, %v367_v54 }
  0x53   : > { %1462 = vmatprep.mubr.msk.f32.mxu0 %vm589_vm4, %v368_v55 }
  0x56   : > { %1463 = vmatmul.mubr.msk.f32.gmra.mrb[12].mxu0 %vm589_vm4, %v369_v56 }
  0x57   : > { %1465 = vmatprep.mubr.msk.f32.mxu0 %vm589_vm4, %v370_v57 }
  0x5a   : > { %1466 = vmatmul.mubr.msk.f32.gmra.mrb[14].mxu0 %vm589_vm4, %v371_v58 }
 0x111   : > { %v1446_v63 = vpop.f32.mrb[0].mxu0 }
 0x112   : > { %v794_v0 = vadd.f32 %v1446_v63, %v1341_v62  ;;  %v707_v1 = vpop.f32.mrb[1].mxu0 }
 0x113   : > { %v793_v2 = vadd.f32 %v1341_v62, %v707_v1 }
 0x114   : > { %v810_v5 = vmax.f32 %v794_v0, 0.0 }
 0x115   : > { %v1449_v3 = vpop.f32.mrb[2].mxu0  ;;  %v809_v4 = vmax.f32 %v793_v2, 0.0 }
 0x116   : > { %v796_v6 = vadd.f32 %v1449_v3, %v1341_v62  ;;  %v717_v7 = vpop.f32.mrb[3].mxu0 }
 0x117   : > { %v795_v8 = vadd.f32 %v1341_v62, %v717_v7  ;;  %1500 = vmatprep.mubr.f32.mxu1 %v809_v4 }
 0x118   : > { %1501 = vmatmul.mubr.f32.vlgmr.msra.gmra.mrb[0].mxu1 %v810_v5  ;;  %v812_v11 = vmax.f32 %v796_v6, 0.0 }
 0x119   : > { %v811_v9 = vmax.f32 %v795_v8, 0.0  ;;  %v1452_v10 = vpop.f32.mrb[4].mxu0 }
 0x11a   : > { %v798_v12 = vadd.f32 %v1452_v10, %v1341_v62  ;;  %v727_v13 = vpop.f32.mrb[5].mxu0 }
 0x11b   : > { %v797_v14 = vadd.f32 %v1341_v62, %v727_v13  ;;  %1503 = vmatprep.mubr.f32.mxu1 %v811_v9 }
 0x11c   : > { %1504 = vmatmul.mubr.f32.gmra.mrb[2].mxu1 %v812_v11  ;;  %v814_v17 = vmax.f32 %v798_v12, 0.0 }
 0x11d   : > { %v813_v15 = vmax.f32 %v797_v14, 0.0  ;;  %v1455_v16 = vpop.f32.mrb[6].mxu0 }
 0x11e   : > { %v800_v18 = vadd.f32 %v1455_v16, %v1341_v62  ;;  %v737_v19 = vpop.f32.mrb[7].mxu0 }
 0x11f   : > { %v799_v20 = vadd.f32 %v1341_v62, %v737_v19  ;;  %1506 = vmatprep.mubr.f32.mxu1 %v813_v15 }
 0x120   : > { %1507 = vmatmul.mubr.f32.gmra.mrb[4].mxu1 %v814_v17  ;;  %v816_v23 = vmax.f32 %v800_v18, 0.0 }
 0x121   : > { %v815_v21 = vmax.f32 %v799_v20, 0.0  ;;  %v1458_v22 = vpop.f32.mrb[8].mxu0 }
 0x122   : > { %v802_v24 = vadd.f32 %v1458_v22, %v1341_v62  ;;  %v747_v25 = vpop.f32.mrb[9].mxu0 }
 0x123   : > { %v801_v26 = vadd.f32 %v1341_v62, %v747_v25  ;;  %1509 = vmatprep.mubr.f32.mxu1 %v815_v21 }
 0x124   : > { %1510 = vmatmul.mubr.f32.gmra.mrb[6].mxu1 %v816_v23  ;;  %v818_v29 = vmax.f32 %v802_v24, 0.0 }
 0x125   : > { %v817_v27 = vmax.f32 %v801_v26, 0.0  ;;  %v1461_v28 = vpop.f32.mrb[10].mxu0 }
 0x126   : > { %v804_v30 = vadd.f32 %v1461_v28, %v1341_v62  ;;  %v757_v31 = vpop.f32.mrb[11].mxu0 }
 0x127   : > { %v803_v32 = vadd.f32 %v1341_v62, %v757_v31  ;;  %1512 = vmatprep.mubr.f32.mxu1 %v817_v27 }
 0x128   : > { %1513 = vmatmul.mubr.f32.gmra.mrb[8].mxu1 %v818_v29  ;;  %v820_v35 = vmax.f32 %v804_v30, 0.0 }
 0x129   : > { %v819_v33 = vmax.f32 %v803_v32, 0.0  ;;  %v1464_v34 = vpop.f32.mrb[12].mxu0 }
 0x12a   : > { %v806_v36 = vadd.f32 %v1464_v34, %v1341_v62  ;;  %v767_v37 = vpop.f32.mrb[13].mxu0 }
 0x12b   : > { %v805_v38 = vadd.f32 %v1341_v62, %v767_v37  ;;  %1515 = vmatprep.mubr.f32.mxu1 %v819_v33 }
 0x12c   : > { %1516 = vmatmul.mubr.f32.gmra.mrb[10].mxu1 %v820_v35  ;;  %v822_v41 = vmax.f32 %v806_v36, 0.0 }
 0x12d   : > { %v821_v39 = vmax.f32 %v805_v38, 0.0  ;;  %v1467_v40 = vpop.f32.mrb[14].mxu0  ;;  %v1064_v38 = vld [vmem:[#allocation2] sm:$0x1] }
 0x12e   : > { %v808_v42 = vadd.f32 %v1467_v40, %v1341_v62  ;;  %v777_v43 = vpop.f32.mrb[15].mxu0 }
 0x12f   : > { %v807_v44 = vadd.f32 %v1341_v62, %v777_v43  ;;  %1518 = vmatprep.mubr.f32.mxu1 %v821_v39 }
 0x130   : > { %1519 = vmatmul.mubr.f32.gmra.mrb[12].mxu1 %v822_v41  ;;  %v824_v46 = vmax.f32 %v808_v42, 0.0 }
 0x131   : > { %v823_v45 = vmax.f32 %v807_v44, 0.0 }
 0x133   : > { %1521 = vmatprep.mubr.f32.mxu1 %v823_v45 }
 0x134   : > { %1522 = vmatmul.mubr.f32.gmra.mrb[14].mxu1 %v824_v46 }
 0x1eb   : > { %v1502_v49 = vpop.f32.mrb[0].mxu1 }
 0x1ec   : > { %v920_v50 = vadd.f32 %v1502_v49, %v1942_v48  ;;  %v914_v51 = vpop.f32.mrb[1].mxu1 }
 0x1ed   : > { %v915_v52 = vadd.f32 %v1942_v48, %v914_v51 }
 0x1ee   : > { %v994_v54 = vmax.f32 %v920_v50, 0.0 }
 0x1ef   : > { %v1505_v55 = vpop.f32.mrb[2].mxu1  ;;  %v993_v56 = vmax.f32 %v915_v52, 0.0 }
 0x1f0   : > { %v930_v57 = vadd.f32 %v1505_v55, %v1942_v48  ;;  %v924_v58 = vpop.f32.mrb[3].mxu1  ;;  %v1017_v59 = vmul.f32 %v1949_v53, %v994_v54 }
 0x1f1   : > { %v925_v60 = vadd.f32 %v1942_v48, %v924_v58  ;;  %v1016_v2 = vmul.f32 %v1949_v53, %v993_v56 }
 0x1f2   : > { %v996_v61 = vmax.f32 %v930_v57, 0.0  ;;  %1034 = vadd.xlane.f32.xlu0 %v1017_v59  ;;  %v1070_v59 = vlaneseq }
 0x1f3   : > { %v1508_v62 = vpop.f32.mrb[4].mxu1  ;;  %v995_v63 = vmax.f32 %v925_v60, 0.0 }
 0x1f4   : > { %v940_v0 = vadd.f32 %v1508_v62, %v1942_v48  ;;  %v934_v1 = vpop.f32.mrb[5].mxu1  ;;  %v1019_v3 = vmul.f32 %v1949_v53, %v996_v61  ;;  %v1981_v61 = vshrl.u32 %v1070_v59, 7 }
 0x1f5   : > { %v935_v4 = vadd.f32 %v1942_v48, %v934_v1  ;;  %v1018_v10 = vmul.f32 %v1949_v53, %v995_v63  ;;  %v1984_v63 = vand.u32 127, %v1070_v59 }
 0x1f6   : > { %1032 = vadd.xlane.f32.xlu0 %v1016_v2  ;;  %1038 = vadd.xlane.f32.xlu1 %v1019_v3  ;;  %v998_v7 = vmax.f32 %v940_v0, 0.0  ;;  %v1072_v62 = vsub.s32 0, %v1981_v61 }
 0x1f7   : > { %v997_v5 = vmax.f32 %v935_v4, 0.0  ;;  %v1511_v6 = vpop.f32.mrb[6].mxu1  ;;  %v1112_v2 = vadd.s32 4294967288, %v1984_v63  ;;  %v1119_v3 = vadd.s32 4294967280, %v1984_v63  ;;  %v1196_v59 = vadd.s32 4294967192, %v1984_v63 }
 0x1f8   : > { %v950_v8 = vadd.f32 %v1511_v6, %v1942_v48  ;;  %v944_v9 = vpop.f32.mrb[7].mxu1  ;;  %v1021_v16 = vmul.f32 %v1949_v53, %v998_v7  ;;  %v1110_v7 = vsub.s32 %v1984_v63, %v1981_v61 }
 0x1f9   : > { %v945_v11 = vadd.f32 %v1942_v48, %v944_v9  ;;  %v1020_v12 = vmul.f32 %v1949_v53, %v997_v5 }
 0x1fa   : > { %v1000_v13 = vmax.f32 %v950_v8, 0.0  ;;  %1036 = vadd.xlane.f32.xlu1 %v1018_v10  ;;  %v1115_v8 = vsub.s32 %v1112_v2, %v1981_v61  ;;  %v1122_v10 = vsub.s32 %v1119_v3, %v1981_v61 }
 0x1fb   : > { %1040 = vadd.xlane.f32.xlu0 %v1020_v12  ;;  %v1514_v14 = vpop.f32.mrb[8].mxu1  ;;  %v999_v18 = vmax.f32 %v945_v11, 0.0 }
 0x1fc   : > { %v954_v15 = vpop.f32.mrb[9].mxu1  ;;  %v1023_v17 = vmul.f32 %v1949_v53, %v1000_v13  ;;  %v960_v19 = vadd.f32 %v1514_v14, %v1942_v48  ;;  %v1126_v13 = vadd.s32 4294967272, %v1984_v63 }
 0x1fd   : > { %v955_v24 = vadd.f32 %v1942_v48, %v954_v15  ;;  %v1022_v25 = vmul.f32 %v1949_v53, %v999_v18 }
 0x1fe   : > { %1042 = vadd.xlane.f32.xlu1 %v1021_v16  ;;  %v1002_v23 = vmax.f32 %v960_v19, 0.0  ;;  %v1133_v16 = vadd.s32 4294967264, %v1984_v63  ;;  %v1129_v19 = vsub.s32 %v1126_v13, %v1981_v61 }
 0x1ff   : > { %1046 = vadd.xlane.f32.xlu0 %v1023_v17  ;;  %v1517_v20 = vpop.f32.mrb[10].mxu1  ;;  %v1001_v30 = vmax.f32 %v955_v24, 0.0 }
 0x200   : > { %v970_v21 = vadd.f32 %v1517_v20, %v1942_v48  ;;  %v964_v22 = vpop.f32.mrb[11].mxu1  ;;  %v1025_v32 = vmul.f32 %v1949_v53, %v1002_v23  ;;  %v1140_v20 = vadd.s32 4294967256, %v1984_v63  ;;  %v1136_v23 = vsub.s32 %v1133_v16, %v1981_v61 }
 0x201   : > { %v965_v31 = vadd.f32 %v1942_v48, %v964_v22  ;;  %v1024_v37 = vmul.f32 %v1949_v53, %v1001_v30 }
 0x202   : > { %v1004_v26 = vmax.f32 %v970_v21, 0.0 }
 0x203   : > { %1044 = vadd.xlane.f32.xlu0 %v1022_v25  ;;  %v1520_v27 = vpop.f32.mrb[12].mxu1  ;;  %v1003_v35 = vmax.f32 %v965_v31, 0.0 }
 0x204   : > { %v974_v28 = vpop.f32.mrb[13].mxu1  ;;  %v1027_v29 = vmul.f32 %v1949_v53, %v1004_v26  ;;  %v980_v36 = vadd.f32 %v1520_v27, %v1942_v48  ;;  %v1147_v26 = vadd.s32 4294967248, %v1984_v63 }
 0x205   : > { %v975_v40 = vadd.f32 %v1942_v48, %v974_v28  ;;  %v1026_v41 = vmul.f32 %v1949_v53, %v1003_v35  ;;  %v1161_v35 = vadd.s32 4294967232, %v1984_v63 }
 0x206   : > { %v1006_v39 = vmax.f32 %v980_v36, 0.0  ;;  %v1150_v31 = vsub.s32 %v1147_v26, %v1981_v61 }
 0x207   : > { %1050 = vadd.xlane.f32.xlu0 %v1025_v32  ;;  %v1523_v33 = vpop.f32.mrb[14].mxu1  ;;  %v1005_v42 = vmax.f32 %v975_v40, 0.0  ;;  %v1154_v32 = vadd.s32 4294967240, %v1984_v63 }
 0x208   : > { %v984_v34 = vpop.f32.mrb[15].mxu1  ;;  %v1029_v44 = vmul.f32 %v1949_v53, %v1006_v39  ;;  %v990_v45 = vadd.f32 %v1523_v33, %v1942_v48 }
 0x209   : > { %v985_v43 = vadd.f32 %v1942_v48, %v984_v34  ;;  %v1028_v47 = vmul.f32 %v1949_v53, %v1005_v42 }
 0x20a   : > { %v1008_v49 = vmax.f32 %v990_v45, 0.0  ;;  %v1175_v45 = vadd.s32 4294967216, %v1984_v63 }
 0x20b   : > { %1048 = vadd.xlane.f32.xlu0 %v1024_v37  ;;  %v1007_v46 = vmax.f32 %v985_v43, 0.0  ;;  %v1164_v43 = vsub.s32 %v1161_v35, %v1981_v61 }
 0x20c   : > { %v1031_v51 = vmul.f32 %v1949_v53, %v1008_v49 }
 0x20d   : > { %v1030_v50 = vmul.f32 %v1949_v53, %v1007_v46 }
 0x20f   : > { %1067 = vperm.xlu1 %1619, %v1064_v38   ;;  %1052 = vadd.xlane.f32.xlu0 %v1026_v41  ;;  %v1168_v38 = vadd.s32 4294967224, %v1984_v63  ;;  %v1157_v41 = vsub.s32 %v1154_v32, %v1981_v61 }
 0x211   : > { %v1171_v49 = vsub.s32 %v1168_v38, %v1981_v61 }
 0x213   : > { %1058 = vadd.xlane.f32.xlu0 %v1029_v44 }
 0x217   : > { %1056 = vadd.xlane.f32.xlu0 %v1028_v47 }
 0x21b   : > { %1060 = vadd.xlane.f32.xlu0 %v1030_v50 }
 0x21f   : > { %1062 = vadd.xlane.f32.xlu0 %v1031_v51  ;;  %v1182_v51 = vadd.s32 4294967208, %v1984_v63 }
 0x233   : > { %1054 = vadd.xlane.f32.xlu1 %v1027_v29  ;;  %v1143_v29 = vsub.s32 %v1140_v20, %v1981_v61 }
 0x27f   : > { %v1035_v52 = vpop.xlane.xlu0 %1034 }
 0x283   : > { %v1033_v54 = vpop.xlane.xlu0 %1032  ;;  %v1039_v55 = vpop.xlane.xlu1 %1038 }
 0x287   : > { %v1037_v57 = vpop.xlane.xlu1 %1036 }
 0x288   : > { %v1041_v56 = vpop.xlane.xlu0 %1040 }
 0x28b   : > { %v1043_v48 = vpop.xlane.xlu1 %1042 }
 0x28c   : > { %v1047_v58 = vpop.xlane.xlu0 %1046 }
 0x28f   : > { %v1068_v0 = vpop.permute.xlu1 %1067 }
 0x290   : > { %v1045_v60 = vpop.xlane.xlu0 %1044  ;;  %v1986_v53 = vrot.slane %v1068_v0, %v1072_v62  ;;  %v1185_v62 = vsub.s32 %v1182_v51, %v1981_v61 }
 0x292   : > { %v1074_v5 = vadd.f32 %v1986_v53, %v1033_v54  ;;  %v1075_v6 = vadd.f32 %v1986_v53, %v1035_v52  ;;  %v1076_v9 = vadd.f32 %v1986_v53, %v1037_v57  ;;  %v1077_v17 = vadd.f32 %v1986_v53, %v1039_v55 }
 0x293   : > { %v1078_v21 = vadd.f32 %v1986_v53, %v1041_v56  ;;  %v1079_v27 = vadd.f32 %v1986_v53, %v1043_v48  ;;  %v1080_v34 = vadd.f32 %v1986_v53, %v1045_v60  ;;  %v1081_v40 = vadd.f32 %v1986_v53, %v1047_v58 }
 0x294   : > { %v1051_v1 = vpop.xlane.xlu0 %1050  ;;  %v1111_v11 = vrot.slane %v1074_v5, %v1110_v7  ;;  %v1116_v12 = vrot.slane %v1075_v6, %v1115_v8  ;;  %v1123_v15 = vrot.slane %v1076_v9, %v1122_v10  ;;  %v1130_v25 = vrot.slane %v1077_v17, %v1129_v19 }
 0x295   : > { %v1137_v30 = vrot.slane %v1078_v21, %v1136_v23  ;;  %v1144_v37 = vrot.slane %v1079_v27, %v1143_v29  ;;  %v1151_v42 = vrot.slane %v1080_v34, %v1150_v31  ;;  %v1158_v50 = vrot.slane %v1081_v40, %v1157_v41 }
 0x296   : > { %v1118_v18 = vsel %vm1117_vm5, %v1116_v12, %v1111_v11  ;;  %v1178_v54 = vsub.s32 %v1175_v45, %v1981_v61  ;;  %v1189_v56 = vadd.s32 4294967200, %v1984_v63  ;;  %v1083_v57 = vadd.f32 %v1986_v53, %v1051_v1 }
 0x297   : > { %v1125_v22 = vsel %vm1124_vm6, %v1123_v15, %v1118_v18  ;;  %v1203_v48 = vadd.s32 4294967184, %v1984_v63  ;;  %v1210_v60 = vadd.s32 4294967176, %v1984_v63  ;;  %v1199_v7 = vsub.s32 %v1196_v59, %v1981_v61 }
 0x298   : > { %v1049_v4 = vpop.xlane.xlu0 %1048  ;;  %v1132_v28 = vsel %vm1131_vm7, %v1130_v25, %v1125_v22  ;;  %v1192_v3 = vsub.s32 %v1189_v56, %v1981_v61  ;;  %v1172_v6 = vrot.slane %v1083_v57, %v1171_v49 }
 0x299   : > { %v1139_v33 = vsel %vm1138_vm8, %v1137_v30, %v1132_v28  ;;  %v1082_v44 = vadd.f32 %v1986_v53, %v1049_v4  ;;  %v1206_v9 = vsub.s32 %v1203_v48, %v1981_v61  ;;  %v1213_v11 = vsub.s32 %v1210_v60, %v1981_v61 }
 0x29a   : > { %v1146_v39 = vsel %vm1145_vm9, %v1144_v37, %v1139_v33 }
 0x29b   : > { %v1153_v46 = vsel %vm1152_vm10, %v1151_v42, %v1146_v39  ;;  %v1165_v52 = vrot.slane %v1082_v44, %v1164_v43 }
 0x29c   : > { %v1053_v14 = vpop.xlane.xlu0 %1052  ;;  %v1160_v58 = vsel %vm1159_vm11, %v1158_v50, %v1153_v46 }
 0x29d   : > { %v1084_v55 = vadd.f32 %v1986_v53, %v1053_v14  ;;  %v1167_v0 = vsel %vm1166_vm12, %v1165_v52, %v1160_v58 }
 0x29e   : > { %v1174_v12 = vsel %vm1173_vm13, %v1172_v6, %v1167_v0 }
 0x29f   : > { %v1179_v2 = vrot.slane %v1084_v55, %v1178_v54 }
 0x2a0   : > { %v1059_v24 = vpop.xlane.xlu0 %1058 }
 0x2a1   : > { %v1087_v8 = vadd.f32 %v1986_v53, %v1059_v24  ;;  %v1181_v15 = vsel %vm1180_vm14, %v1179_v2, %v1174_v12 }
 0x2a3   : > { %v1200_v17 = vrot.slane %v1087_v8, %v1199_v7 }
 0x2a4   : > { %v1057_v36 = vpop.xlane.xlu0 %1056 }
 0x2a5   : > { %v1086_v4 = vadd.f32 %v1986_v53, %v1057_v36 }
 0x2a7   : > { %v1193_v16 = vrot.slane %v1086_v4, %v1192_v3 }
 0x2a8   : > { %v1061_v47 = vpop.xlane.xlu0 %1060 }
 0x2a9   : > { %v1088_v10 = vadd.f32 %v1986_v53, %v1061_v47 }
 0x2ab   : > { %v1207_v61 = vrot.slane %v1088_v10, %v1206_v9 }
 0x2ac   : > { %v1063_v1 = vpop.xlane.xlu0 %1062 }
 0x2ad   : > { %v1089_v13 = vadd.f32 %v1986_v53, %v1063_v1 }
 0x2af   : > { %v1214_v20 = vrot.slane %v1089_v13, %v1213_v11 }
 0x2c0   : > { %v1055_v5 = vpop.xlane.xlu1 %1054 }
 0x2c1   : > { %v1085_v63 = vadd.f32 %v1986_v53, %v1055_v5 }
 0x2c3   : > { %v1186_v14 = vrot.slane %v1085_v63, %v1185_v62 }
 0x2c5   : > { %v1188_v18 = vsel %vm1187_vm15, %v1186_v14, %v1181_v15 }
 0x2c6   : > { %v1195_v19 = vsel %vm1194_vm0, %v1193_v16, %v1188_v18 }
 0x2c7   : > { %v1202_v53 = vsel %vm1201_vm1, %v1200_v17, %v1195_v19 }
 0x2c8   : > { %v1209_v21 = vsel %vm1208_vm2, %v1207_v61, %v1202_v53 }
 0x2c9   : > { %v1216_v22 = vsel %vm1215_vm3, %v1214_v20, %v1209_v21 }
 0x2ca   : > { %1218 = vst [vmem:[%s343_s29] sm:$0x1] %v1216_v22 }
 0x2cb   : > { %1634 = shalt.err (!%p1631_p3)
}
 0x2cc   : > { %s1635_s24 = scalar_lea.hbm %s2045_s8, 16  ;;  %s1639_s28 = scalar_lea.hbm %s2098_s9, 32 }
 0x2cd   : > { %p1636_p4 = scmp.ne.s32.totalorder %s2045_s8, %s1635_s24  ;;  %p1640_p9 = scmp.lt.u32.totalorder %s2045_s8, %s2098_s9 }
 0x2ce   : > { %p1641_p10 = scmp.lt.u32.totalorder %s1639_s28, %s1635_s24  ;;  %p1643_p12 = scmp.lt.u32.totalorder %s1635_s24, %s2045_s8 }
 0x2cf   : > { %p1637_p7 = pnand %p1636_p4, %p1776_p5 }
 0x2d0   : > { %p1642_p11 = por %p1641_p10, %p1640_p9 }
 0x2d1   : > { %p1638_p8 = pneg %p1637_p7 }
 0x2d2   : > { %p1644_p13 = por %p1643_p12, %p1642_p11 }
 0x2d4   : > { %p1645_p0 = pnand %p1644_p13, %p1638_p8 }
 0x2d6   : > { %1648 = shalt.err (!%p1645_p0)
}
 0x2d7   : > { %1578 = dma.vmem_to_hbm [thread:$0]  (%p1776_p5), %s2047_s30, 16, %s2045_s8, %s1220_s10  }
 0x2d8 PF: > { %p1584_p1 = scmp.ge.s32.totalorder %s1683_s14, 2  ;;  %s1244_s25 = sand.u32 1, %s1671_s11  }
 0x2d9   : > { %s1245_s15 = scalar_lea.sflag [#allocation4], %s1244_s25 }
 0x2da   : > { %p1581_p2 = pnand %p1584_p1, %p1780_p6 }
 0x2dc   : > { %1666 = dma.done.wait (!%p1581_p2), %s1245_s15, 16  }
 0x2dd   : > { %1668 = vsyncadd (!%p1581_p2), %s1245_s15, 4294967280  ;;  %p21_p3 = scmp.ge.s32.totalorder %s1764_s16, 4   ;;  %s2103_s11 = smov %s1675_s12 }
 0x2de   : > { %s2104_s12 = smov %s1679_s13  ;;  %s2105_s13 = smov %s1774_s19 }
 0x2df   : > { %s2106_s14 = smov %s1764_s16  ;;  %23 = sbr.rel (!%p21_p3) target bundleno = 6 (0x6), region = 94 }
 0x2e6   :  { %1249 = vsyncpa [#allocation4], 1 }
 0x2e7   :  { %1251 = vsyncpa [#allocation4 + $0x1], 1 }

</bundles_post_ra>
